<compile_context>
chip_gen: v5e
topology: v5e:2x2
jax: 0.10.0
libtpu: 0.0.40
codegen_flags: <defaults>
</compile_context>

<pallas_src>
import functools

import jax
import jax.numpy as jnp
from jax import lax
from jax.experimental import pallas as pl
from jax.experimental.pallas import tpu as pltpu

_HIGHEST = lax.Precision.HIGHEST


def _sigmoid(z):
    # exp lands on the EUP; pl.reciprocal (exact) for the divide.
    return pl.reciprocal(1.0 + jnp.exp(-z))


# ---------------------------------------------------------------------------
# Path A: single-pass kernel.  One (Nb, C, HW) slab per grid step.
# ---------------------------------------------------------------------------
def _se_single_pass_kernel(x_ref, w1t_ref, b1_ref, w2t_ref, b2_ref, o_ref, *,
                           inv_hw):
    x = x_ref[...]                                                # (Nb, C, HW) native dtype
    # Exact f32 spatial sum (VPU/XLU are idle in this HBM-bound kernel).
    pooled = jnp.sum(x, axis=-1, dtype=jnp.float32) * inv_hw      # (Nb, C) f32
    # Tiny FCs in full f32 precision (matches the f32 PyTorch module).
    h = jnp.dot(pooled, w1t_ref[...], precision=_HIGHEST,
                preferred_element_type=jnp.float32) + b1_ref[...]  # (Nb, R)
    h = h * _sigmoid(h)                                            # SiLU
    s = _sigmoid(jnp.dot(h, w2t_ref[...], precision=_HIGHEST,
                         preferred_element_type=jnp.float32)
                 + b2_ref[...])                                    # (Nb, C)
    # Excite: broadcast per-channel scale over the lane (spatial) axis,
    # keeping the slab in its native dtype.
    o_ref[...] = (x * s[:, :, None].astype(x.dtype)).astype(o_ref.dtype)


# ---------------------------------------------------------------------------
# Path B, pass 1: spatial-tiled pooling + scale computation.
# Grid (N, HW_tiles); the (C, 1) output block is revisited across the tile
# axis and doubles as the accumulator.
# ---------------------------------------------------------------------------
def _se_pool_scale_kernel(x_ref, w1_ref, b1_ref, w2_ref, b2_ref, s_ref, *,
                          hw, inv_hw):
    t = pl.program_id(1)

    @pl.when(t == 0)
    def _():
        s_ref[...] = jnp.zeros_like(s_ref)

    x = x_ref[...]                                                 # (C, THW)
    thw = x.shape[1]
    if hw % thw != 0:
        # Mask the out-of-bounds tail of the last (partial) tile so stale
        # VMEM contents cannot leak into the pooled sum.
        col = lax.broadcasted_iota(jnp.int32, x.shape, 1) + t * thw
        x = jnp.where(col < hw, x, jnp.zeros_like(x))
    s_ref[...] += jnp.sum(x, axis=-1, keepdims=True, dtype=jnp.float32)  # (C, 1)

    @pl.when(t == pl.num_programs(1) - 1)
    def _():
        pooled = s_ref[...] * inv_hw                               # (C, 1) f32
        h = jnp.dot(w1_ref[...], pooled, precision=_HIGHEST,
                    preferred_element_type=jnp.float32) + b1_ref[...]   # (R, 1)
        h = h * _sigmoid(h)                                             # SiLU
        s_ref[...] = _sigmoid(jnp.dot(w2_ref[...], h, precision=_HIGHEST,
                                      preferred_element_type=jnp.float32)
                              + b2_ref[...])                            # (C, 1)


# ---------------------------------------------------------------------------
# Path B, pass 2: apply the per-channel scale per spatial tile.
# ---------------------------------------------------------------------------
def _se_apply_kernel(x_ref, s_ref, o_ref):
    x = x_ref[...]                                                 # (C, THW)
    s = s_ref[...]                                                 # (C, 1) f32
    o_ref[...] = (x * s.astype(x.dtype)).astype(o_ref.dtype)


def _vmem_capacity_bytes():
    try:
        info = pltpu.get_tpu_info()
        cap = getattr(info, "vmem_capacity_bytes", None)
        if cap:
            return int(cap)
    except Exception:
        pass
    return 64 << 20  # conservative default (v7x physical VMEM)


def _round_up(x, m):
    return ((x + m - 1) // m) * m


def _vmem_limit(needed, cap):
    return int(min(max(needed, 32 << 20), cap))


def squeeze_excitation(x_nchw, w1, b1, w2, b2, *, force_two_pass=False,
                       spatial_tile=None):
    """EfficientNet SqueezeExcitation forward.

    x_nchw: (N, C, H, W); w1: (R, C); b1: (R,); w2: (C, R); b2: (C,)
    (w1/w2 are the squeezed (out, in) 1x1-conv weights.)
    """
    N, C, H, W = x_nchw.shape
    R = w1.shape[0]
    HW = H * W
    inv_hw = 1.0 / HW
    itemsize = jnp.dtype(x_nchw.dtype).itemsize

    # Free metadata reshape; no padding / slicing around the kernel.
    x_flat = x_nchw.reshape(N, C, HW)

    w1_f = w1.astype(jnp.float32)
    b1_f = b1.astype(jnp.float32)
    w2_f = w2.astype(jnp.float32)
    b2_f = b2.astype(jnp.float32)

    # Generation-aware scoped-VMEM cap; account for double-buffered params.
    vmem_cap = (_vmem_capacity_bytes() * 3) // 4
    param_bytes = 2 * 4 * (2 * R * C + R + C)      # double-buffered f32 params
    headroom = 4 << 20
    budget = vmem_cap - param_bytes - headroom

    slab_bytes = C * HW * itemsize                 # one batch element (in or out)

    if not force_two_pass and 4 * slab_bytes <= budget:
        # ---------------- Path A: single pass, Nb batch elements per step ----
        target_block = 8 << 20                     # amortize per-step overhead
        nb = max(1, min(N, budget // (4 * slab_bytes)))
        nb = min(nb, max(1, target_block // max(slab_bytes, 1)))
        while N % nb:
            nb -= 1
        vmem_bytes = _vmem_limit(4 * nb * slab_bytes + param_bytes + headroom,
                                 vmem_cap)

        kernel = functools.partial(_se_single_pass_kernel, inv_hw=inv_hw)
        out_flat = pl.pallas_call(
            kernel,
            out_shape=jax.ShapeDtypeStruct((N, C, HW), x_nchw.dtype),
            grid_spec=pltpu.PrefetchScalarGridSpec(
                num_scalar_prefetch=0,
                grid=(N // nb,),
                in_specs=[
                    pl.BlockSpec((nb, C, HW), lambda n: (n, 0, 0)),   # x
                    pl.BlockSpec((C, R), lambda n: (0, 0)),           # w1^T
                    pl.BlockSpec((1, R), lambda n: (0, 0)),           # b1 row
                    pl.BlockSpec((R, C), lambda n: (0, 0)),           # w2^T
                    pl.BlockSpec((1, C), lambda n: (0, 0)),           # b2 row
                ],
                out_specs=pl.BlockSpec((nb, C, HW), lambda n: (n, 0, 0)),
            ),
            compiler_params=pltpu.CompilerParams(
                dimension_semantics=("parallel",),
                vmem_limit_bytes=vmem_bytes,
            ),
        )(x_flat, w1_f.T, b1_f.reshape(1, R), w2_f.T, b2_f.reshape(1, C))
        return out_flat.reshape(N, C, H, W)

    # ---------------- Path B: two-pass spatial tiling -------------------------
    # TODO(synk): for very-small-HW / large-C stages a layout flip (C on lanes,
    # HW on sublanes) would cut masked-store waste further; not needed now that
    # no host-side padding is done.
    if spatial_tile is not None:
        thw = int(spatial_tile)
    else:
        thw = max(budget // (4 * C * itemsize), 128)
    thw = max(128, (thw // 128) * 128)             # lane-dense tile
    thw = min(thw, _round_up(HW, 128))
    if thw >= HW:
        thw = HW                                   # full-extent last dim is legal
    n_t = pl.cdiv(HW, thw)

    x_block_bytes = C * thw * itemsize
    s_bytes = 2 * C * 4
    vmem_bytes_1 = _vmem_limit(2 * x_block_bytes + param_bytes + s_bytes + headroom,
                               vmem_cap)
    vmem_bytes_2 = _vmem_limit(4 * x_block_bytes + s_bytes + headroom, vmem_cap)

    kernel1 = functools.partial(_se_pool_scale_kernel, hw=HW, inv_hw=inv_hw)
    s_col = pl.pallas_call(
        kernel1,
        out_shape=jax.ShapeDtypeStruct((N, C, 1), jnp.float32),
        grid_spec=pltpu.PrefetchScalarGridSpec(
            num_scalar_prefetch=0,
            grid=(N, n_t),
            in_specs=[
                pl.BlockSpec((pl.Squeezed(), C, thw), lambda n, t: (n, 0, t)),  # x tile
                pl.BlockSpec((R, C), lambda n, t: (0, 0)),                      # w1
                pl.BlockSpec((R, 1), lambda n, t: (0, 0)),                      # b1 col
                pl.BlockSpec((C, R), lambda n, t: (0, 0)),                      # w2
                pl.BlockSpec((C, 1), lambda n, t: (0, 0)),                      # b2 col
            ],
            out_specs=pl.BlockSpec((pl.Squeezed(), C, 1), lambda n, t: (n, 0, 0)),
        ),
        compiler_params=pltpu.CompilerParams(
            dimension_semantics=("parallel", "arbitrary"),
            vmem_limit_bytes=vmem_bytes_1,
        ),
    )(x_flat, w1_f, b1_f.reshape(R, 1), w2_f, b2_f.reshape(C, 1))

    out_flat = pl.pallas_call(
        _se_apply_kernel,
        out_shape=jax.ShapeDtypeStruct((N, C, HW), x_nchw.dtype),
        grid_spec=pltpu.PrefetchScalarGridSpec(
            num_scalar_prefetch=0,
            grid=(N, n_t),
            in_specs=[
                pl.BlockSpec((pl.Squeezed(), C, thw), lambda n, t: (n, 0, t)),  # x tile
                pl.BlockSpec((pl.Squeezed(), C, 1), lambda n, t: (n, 0, 0)),    # scale
            ],
            out_specs=pl.BlockSpec((pl.Squeezed(), C, thw), lambda n, t: (n, 0, t)),
        ),
        compiler_params=pltpu.CompilerParams(
            dimension_semantics=("parallel", "parallel"),
            vmem_limit_bytes=vmem_bytes_2,
        ),
    )(x_flat, s_col)
    return out_flat.reshape(N, C, H, W)


def _reference(x, w1, b1, w2, b2):
    # Full-f32 reference (matches the f32 PyTorch module).
    pooled = jnp.mean(x, axis=(2, 3))                                       # (N, C)
    h = jnp.dot(pooled, w1.T, precision=_HIGHEST) + b1                      # (N, R)
    h = h * jax.nn.sigmoid(h)
    s = jax.nn.sigmoid(jnp.dot(h, w2.T, precision=_HIGHEST) + b2)           # (N, C)
    return x * s[:, :, None, None]


if __name__ == "__main__":
    key = jax.random.PRNGKey(0)
    N, C, H, W = 2, 4, 16, 16
    R = 2  # reduced_dim

    k_x, k_w1, k_b1, k_w2, k_b2 = jax.random.split(key, 5)
    x = jax.random.normal(k_x, (N, C, H, W), dtype=jnp.float32)
    # Stand-ins for nn.Conv2d weights of shape (out, in, 1, 1) squeezed to (out, in).
    w1 = jax.random.normal(k_w1, (R, C), dtype=jnp.float32) * 0.1
    b1 = jax.random.normal(k_b1, (R,), dtype=jnp.float32) * 0.1
    w2 = jax.random.normal(k_w2, (C, R), dtype=jnp.float32) * 0.1
    b2 = jax.random.normal(k_b2, (C,), dtype=jnp.float32) * 0.1

    ref = _reference(x, w1, b1, w2, b2)

    # Path A: single-pass, batch-blocked.
    out_a = jax.block_until_ready(squeeze_excitation(x, w1, b1, w2, b2))
    assert out_a.shape == (N, C, H, W)
    assert jnp.allclose(out_a, ref, atol=1e-5, rtol=1e-5), "Path A mismatch"

    # Path B: two-pass spatial tiling, forced at a small shape.
    out_b = jax.block_until_ready(
        squeeze_excitation(x, w1, b1, w2, b2, force_two_pass=True, spatial_tile=128))
    assert jnp.allclose(out_b, ref, atol=1e-5, rtol=1e-5), "Path B mismatch"

    # Non-multiple-of-128 spatial size (HW = 200): exercises the masked tail
    # tile in Path B and the masked-vst (unpadded) store in Path A.
    H2, W2 = 10, 20
    x2 = jax.random.normal(k_x, (N, C, H2, W2), dtype=jnp.float32)
    ref2 = _reference(x2, w1, b1, w2, b2)
    out_c = jax.block_until_ready(
        squeeze_excitation(x2, w1, b1, w2, b2, force_two_pass=True, spatial_tile=128))
    assert jnp.allclose(out_c, ref2, atol=1e-5, rtol=1e-5), "Path B (ragged) mismatch"
    out_d = jax.block_until_ready(squeeze_excitation(x2, w1, b1, w2, b2))
    assert jnp.allclose(out_d, ref2, atol=1e-5, rtol=1e-5), "Path A (ragged) mismatch"

    print("KERNEL_OK")
</pallas_src>

<mosaic_0001>
module attributes {stable_mosaic.version = 11 : i64} {
  func.func @_se_single_pass_kernel(%arg0: i32, %arg1: memref<2x4x256xf32, #tpu.memory_space<vmem>>, %arg2: memref<4x2xf32, #tpu.memory_space<vmem>>, %arg3: memref<1x2xf32, #tpu.memory_space<vmem>>, %arg4: memref<2x4xf32, #tpu.memory_space<vmem>>, %arg5: memref<1x4xf32, #tpu.memory_space<vmem>>, %arg6: memref<2x4x256xf32, #tpu.memory_space<vmem>>) attributes {dimension_semantics = [#tpu.dimension_semantics<parallel>], iteration_bounds = array<i64: 1>, scalar_prefetch = 0 : i64, scratch_operands = 0 : i64, tpu.core_type = #tpu.core_type<tc>, window_params = [{transform_indices = @transform_0, window_bounds = array<i64: 2, 4, 256>}, {pipeline_mode = #tpu.pipeline_mode<synchronous>, transform_indices = @transform_1, window_bounds = array<i64: 4, 2>}, {pipeline_mode = #tpu.pipeline_mode<synchronous>, transform_indices = @transform_2, window_bounds = array<i64: 1, 2>}, {pipeline_mode = #tpu.pipeline_mode<synchronous>, transform_indices = @transform_3, window_bounds = array<i64: 2, 4>}, {pipeline_mode = #tpu.pipeline_mode<synchronous>, transform_indices = @transform_4, window_bounds = array<i64: 1, 4>}, {transform_indices = @transform_5, window_bounds = array<i64: 2, 4, 256>}]} {
    %c0 = arith.constant 0 : index
    %c0_0 = arith.constant 0 : index
    %c0_1 = arith.constant 0 : index
    %0 = vector.load %arg1[%c0, %c0_0, %c0_1] : memref<2x4x256xf32, #tpu.memory_space<vmem>>, vector<2x4x256xf32>
    %cst = arith.constant dense<0.000000e+00> : vector<2x4xf32>
    %1 = vector.multi_reduction <add>, %0, %cst [2] : vector<2x4x256xf32> to vector<2x4xf32>
    %cst_2 = arith.constant 3.906250e-03 : f32
    %2 = vector.broadcast %cst_2 : f32 to vector<2x4xf32>
    %3 = arith.mulf %1, %2 : vector<2x4xf32>
    %c0_3 = arith.constant 0 : index
    %c0_4 = arith.constant 0 : index
    %4 = vector.load %arg2[%c0_3, %c0_4] : memref<4x2xf32, #tpu.memory_space<vmem>>, vector<4x2xf32>
    %cst_5 = arith.constant dense<0.000000e+00> : vector<2x2xf32>
    %5 = tpu.matmul %3, %4, %cst_5 {dimension_numbers = #tpu.dot_dimension_numbers<[1], [0], [0], [1], [0, 0, 1, 1], [], []>, precision = #tpu.contract_precision<fp32>} : vector<2x4xf32>, vector<4x2xf32>, vector<2x2xf32> -> vector<2x2xf32>
    %c0_6 = arith.constant 0 : index
    %c0_7 = arith.constant 0 : index
    %6 = vector.load %arg3[%c0_6, %c0_7] : memref<1x2xf32, #tpu.memory_space<vmem>>, vector<1x2xf32>
    %7 = vector.broadcast %6 : vector<1x2xf32> to vector<2x2xf32>
    %8 = arith.addf %5, %7 : vector<2x2xf32>
    %cst_8 = arith.constant 0.000000e+00 : f32
    %9 = vector.broadcast %cst_8 : f32 to vector<2x2xf32>
    %10 = arith.subf %9, %8 : vector<2x2xf32>
    %11 = math.exp %10 : vector<2x2xf32>
    %cst_9 = arith.constant 1.000000e+00 : f32
    %12 = vector.broadcast %cst_9 : f32 to vector<2x2xf32>
    %13 = arith.addf %12, %11 : vector<2x2xf32>
    %14 = tpu.reciprocal %13 : vector<2x2xf32> -> vector<2x2xf32>
    %15 = arith.mulf %8, %14 : vector<2x2xf32>
    %c0_10 = arith.constant 0 : index
    %c0_11 = arith.constant 0 : index
    %16 = vector.load %arg4[%c0_10, %c0_11] : memref<2x4xf32, #tpu.memory_space<vmem>>, vector<2x4xf32>
    %cst_12 = arith.constant dense<0.000000e+00> : vector<2x4xf32>
    %17 = tpu.matmul %15, %16, %cst_12 {dimension_numbers = #tpu.dot_dimension_numbers<[1], [0], [0], [1], [0, 0, 1, 1], [], []>, precision = #tpu.contract_precision<fp32>} : vector<2x2xf32>, vector<2x4xf32>, vector<2x4xf32> -> vector<2x4xf32>
    %c0_13 = arith.constant 0 : index
    %c0_14 = arith.constant 0 : index
    %18 = vector.load %arg5[%c0_13, %c0_14] : memref<1x4xf32, #tpu.memory_space<vmem>>, vector<1x4xf32>
    %19 = vector.broadcast %18 : vector<1x4xf32> to vector<2x4xf32>
    %20 = arith.addf %17, %19 : vector<2x4xf32>
    %cst_15 = arith.constant 0.000000e+00 : f32
    %21 = vector.broadcast %cst_15 : f32 to vector<2x4xf32>
    %22 = arith.subf %21, %20 : vector<2x4xf32>
    %23 = math.exp %22 : vector<2x4xf32>
    %cst_16 = arith.constant 1.000000e+00 : f32
    %24 = vector.broadcast %cst_16 : f32 to vector<2x4xf32>
    %25 = arith.addf %24, %23 : vector<2x4xf32>
    %26 = tpu.reciprocal %25 : vector<2x4xf32> -> vector<2x4xf32>
    %27 = vector.shape_cast %26 : vector<2x4xf32> to vector<2x4x1xf32>
    %28 = vector.broadcast %27 : vector<2x4x1xf32> to vector<2x4x256xf32>
    %29 = arith.mulf %0, %28 : vector<2x4x256xf32>
    %c0_17 = arith.constant 0 : index
    %c0_18 = arith.constant 0 : index
    %c0_19 = arith.constant 0 : index
    %30 = vector.load %arg6[%c0_17, %c0_18, %c0_19] : memref<2x4x256xf32, #tpu.memory_space<vmem>>, vector<2x4x256xf32>
    tpu.vector_store %arg6[%c0_17, %c0_18, %c0_19], %29 {strides = array<i32>} : memref<2x4x256xf32, #tpu.memory_space<vmem>>, vector<2x4x256xf32>,
    return
  }
  func.func @transform_0(%arg0: i32) -> (i32, i32, i32) {
    %c0_i32 = arith.constant 0 : i32
    %c0_i32_0 = arith.constant 0 : i32
    %c0_i32_1 = arith.constant 0 : i32
    return %arg0, %c0_i32, %c0_i32_0 : i32, i32, i32
  }
  func.func @transform_1(%arg0: i32) -> (i32, i32) {
    %c0_i32 = arith.constant 0 : i32
    %c0_i32_0 = arith.constant 0 : i32
    %c0_i32_1 = arith.constant 0 : i32
    return %c0_i32, %c0_i32_0 : i32, i32
  }
  func.func @transform_2(%arg0: i32) -> (i32, i32) {
    %c0_i32 = arith.constant 0 : i32
    %c0_i32_0 = arith.constant 0 : i32
    %c0_i32_1 = arith.constant 0 : i32
    return %c0_i32, %c0_i32_0 : i32, i32
  }
  func.func @transform_3(%arg0: i32) -> (i32, i32) {
    %c0_i32 = arith.constant 0 : i32
    %c0_i32_0 = arith.constant 0 : i32
    %c0_i32_1 = arith.constant 0 : i32
    return %c0_i32, %c0_i32_0 : i32, i32
  }
  func.func @transform_4(%arg0: i32) -> (i32, i32) {
    %c0_i32 = arith.constant 0 : i32
    %c0_i32_0 = arith.constant 0 : i32
    %c0_i32_1 = arith.constant 0 : i32
    return %c0_i32, %c0_i32_0 : i32, i32
  }
  func.func @transform_5(%arg0: i32) -> (i32, i32, i32) {
    %c0_i32 = arith.constant 0 : i32
    %c0_i32_0 = arith.constant 0 : i32
    %c0_i32_1 = arith.constant 0 : i32
    return %arg0, %c0_i32, %c0_i32_0 : i32, i32, i32
  }
}

</mosaic_0001>

<bundles_post_ra>
// kernel: tpu_custom_call.1
= control target key start
LH: loop header
LB: loop body
LE: loop exit
PB: predicated region body
PF: predicated region fallthrough
CT: control target
= control target key end

     0   :  { %10 = vsyncpa [#allocation3], 0  ;;  %s613_s0 = inlined_call_operand.hbm [shape: f32[2,4,256], index: 0, kind: input, shape index: {}]   ;;  %s614_s1 = inlined_call_operand.vmem [shape: f32[4,2], index: 1, kind: input, shape index: {}]   ;;  %s615_s2 = inlined_call_operand.vmem [shape: f32[1,2], index: 2, kind: input, shape index: {}]   ;;  %s616_s3 = inlined_call_operand.vmem [shape: f32[2,4], index: 3, kind: input, shape index: {}]   ;;  %s617_s4 = inlined_call_operand.vmem [shape: f32[1,4], index: 4, kind: input, shape index: {}]   ;;  %s618_s5 = inlined_call_operand.hbm [shape: f32[2,4,256], index: 5, kind: output, shape index: {}]  }
   0x1   :  { %11 = vsyncpa [#allocation4], 0  ;;  %s16_s20 = sshll.u32 %s613_s0, 4  ;;  %s544_s21 = smov [#allocation2]   ;;  %s17_s20 = int_to_ptr.hbm [resolvable:$true] %s16_s20 }
   0x2   :  { %s18_s22 = sshll.u32 %s544_s21, 4  ;;  %s545_s23 = smov 128   ;;  %s19_s22 = int_to_ptr.vmem [resolvable:$true] %s18_s22 }
   0x3   :  { %s546_s24 = smov 8  }
   0x4   :  { %24 = dma.hbm_to_vmem [thread:$0]  %s17_s20, 256, %s19_s22, [#allocation3], %s545_s23, %s545_s23, %s546_s24  }
   0x5   :  { %540 = dma.done.wait [#allocation3], 256  }
   0x6   :  { %541 = vsyncadd [#allocation3], 4294967040  ;;  %v585_v0 = vld [vmem:[#allocation2] sm:$0xff]  ;;  %v587_v1 = vld [vmem:[#allocation2 + $0x8] sm:$0xff]  ;;  %vm52_vm0 = vcmask 1043456   ;;  %v72_v20 = vlaneseq  ;;  %vm76_vm1 = vcmask 1041409  }
   0x7   :  { %41 = vst [vmem:[#allocation1] ss:$2 sm:$0xff] %v585_v0  ;;  %v65_v12 = vld [vmem:[%s614_s1] sm:$0xf]  ;;  %vm78_vm2 = vcmask 31744   ;;  %vm258_vm3 = vcmask 1041408  }
   0x8   :  { %45 = vst [vmem:[#allocation1 + $0x10] ss:$2 sm:$0xff] %v587_v1  ;;  %v82_v13 = vsel %vm52_vm0, %v65_v12, 0  ;;  %v73_v21 = vand.u32 127, %v72_v20  ;;  %v482_v34 = vld [vmem:[%s615_s2] ss:$0 sm:$0xff] }
   0x9   :  { %v99_v14 = vand.u32 4294901760, %v82_v13  ;;  %v249_v40 = vld [vmem:[%s616_s3] sm:$0x3]  ;;  %vm254_vm8 = vcmask 15360   ;;  %s462_s7 = sshll.u32 %s618_s5, 4  ;;  %s463_s7 = int_to_ptr.hbm [resolvable:$true] %s462_s7 }
   0xa   :  { %v260_v42 = vsel %vm258_vm3, %v249_v40, 0 }
   0xb   :  { %v126_v15 = vsub.f32 %v82_v13, %v99_v14  ;;  %176 = vmatpush.msra.mxu3 %v99_v14  ;;  %100 = vmatpush.msra.mxu0 %v99_v14  ;;  %v277_v44 = vand.u32 4294901760, %v260_v42  ;;  %v428_v13 = vshrl.u32 %v72_v20, 7 }
   0xd   :  { %v127_v16 = vand.u32 4294901760, %v126_v15  ;;  %153 = vmatpush.msra.mxu2 %v126_v15  ;;  %v304_v47 = vsub.f32 %v260_v42, %v277_v44  ;;  %480 = vset.pattern.permute.xlu1 %v428_v13 }
   0xe   :  { %v42_v2 = vld.sshfl [vmem:[#allocation1] sm:$0xff pattern:$0x75316420]  ;;  %v43_v3 = vld.sshfl [vmem:[#allocation1 + $0x8] sm:$0xff pattern:$0x75316420]  ;;  %481 = vset.pattern.permute.xlu0 %v428_v13 }
   0xf   :  { %v53_v4 = vsel %vm52_vm0, %v42_v2, 0.0  ;;  %v54_v5 = vsel %vm52_vm0, %v43_v3, 0.0  ;;  %v46_v7 = vld.sshfl [vmem:[#allocation1 + $0x10] sm:$0xff pattern:$0x75316420]  ;;  %v128_v17 = vsub.f32 %v126_v15, %v127_v16  ;;  %202 = vmatpush.msrb.mxu0 %v127_v16  ;;  %278 = vmatpush.msrb.mxu2 %v277_v44  ;;  %v305_v50 = vand.u32 4294901760, %v304_v47 }
  0x10   :  { %v55_v6 = vadd.f32 %v54_v5, %v53_v4  ;;  %v47_v8 = vld.sshfl [vmem:[#allocation1 + $0x18] sm:$0xff pattern:$0x75316420]  ;;  %v58_v9 = vsel %vm52_vm0, %v46_v7, 0.0 }
  0x11   :  { %v59_v10 = vsel %vm52_vm0, %v47_v8, 0.0  ;;  %v129_v18 = vand.u32 4294901760, %v128_v17  ;;  %v306_v52 = vsub.f32 %v304_v47, %v305_v50 }
  0x12   :  { %56 = vadd.xlane.f32.xlu0 %v55_v6  ;;  %v60_v11 = vadd.f32 %v59_v10, %v58_v9 }
  0x13   :  { %130 = vmatpush.msra.mxu1 %v129_v18  ;;  %v307_v54 = vand.u32 4294901760, %v306_v52 }
  0x15   :  { %224 = vmatpush.msrb.mxu1 %v99_v14  ;;  %308 = vmatpush.msrb.mxu3 %v307_v54  ;;  %v483_v14 = vld [vmem:[%s617_s4] ss:$0 sm:$0xff]  ;;  %s548_s4 = smov [#allocation5]  }
  0x16   :  { %s460_s29 = sshll.u32 %s548_s4, 4  ;;  %s461_s29 = int_to_ptr.vmem [resolvable:$true] %s460_s29 }
  0x1a   :  { %61 = vadd.xlane.f32.xlu0 %v60_v11 }
  0x85   :  { %v57_v19 = vpop.xlane.xlu0 %56 }
  0x86   :  { %v63_v22 = vmul.f32 0.00390625, %v57_v19 }
  0x88   :  { %v74_v25 = vperm.slane %v63_v22, %v73_v21 }
  0x8d   :  { %v62_v23 = vpop.xlane.xlu0 %61 }
  0x8e   :  { %v64_v24 = vmul.f32 0.00390625, %v62_v23 }
  0x90   :  { %v75_v26 = vperm.slane %v64_v24, %v73_v21 }
  0x92   :  { %v77_v27 = vsel %vm76_vm1, %v75_v26, %v74_v25 }
  0x93   :  { %v79_v28 = vsel %vm78_vm2, %v77_v27, 0 }
  0x94   :  { %v101_v29 = vand.u32 4294901760, %v79_v28 }
  0x96   :  { %132 = vmatmul.f32.vlgmr.msra.gmra.mxu1 %v101_v29  ;;  %v102_v30 = vsub.f32 %v79_v28, %v101_v29 }
  0x97   :  { %354 = vmatpush.msra.mxu1 %v277_v44 }
  0x98   :  { %156 = vmatmul.f32.vlgmr.msra.gmra.mxu2 %v102_v30  ;;  %v103_v31 = vand.u32 4294901760, %v102_v30 }
  0x99   :  { %380 = vmatpush.msra.mxu2 %v305_v50 }
  0x9a   :  { %180 = vmatmul.f32.vlgmr.msra.gmra.mxu3 %v103_v31  ;;  %v104_v32 = vsub.f32 %v102_v30, %v103_v31 }
  0x9b   :  { %402 = vmatpush.msra.mxu3 %v277_v44 }
  0x9c   :  { %v105_v33 = vand.u32 4294901760, %v104_v32 }
  0x9e   :  { %106 = vmatmul.f32.vlgmr.msra.gmra.mxu0 %v105_v33  ;;  %226 = vmatmul.f32.vlgmr.msrb.gmra.mxu1 %v101_v29 }
  0x9f   :  { %331 = vmatpush.msra.mxu0 %v304_v47 }
  0xa6   :  { %204 = vmatmul.f32.vlgmr.msrb.gmra.mxu0 %v101_v29 }
 0x113   :  { %v133_v35 = vpop.f32.mrf.mxu1 }
 0x11b   :  { %v107_v36 = vpop.f32.mrf.mxu0  ;;  %v157_v39 = vpop.f32.mrf.mxu2 }
 0x11c   :  { %v108_v37 = vadd.f32 %v482_v34, %v107_v36  ;;  %v227_v49 = vpop.f32.mrf.mxu1 }
 0x11d   :  { %v181_v43 = vpop.f32.mrf.mxu3 }
 0x11e   :  { %v134_v38 = vadd.f32 %v133_v35, %v108_v37 }
 0x120   :  { %v158_v41 = vadd.f32 %v157_v39, %v134_v38 }
 0x122   :  { %v182_v45 = vadd.f32 %v181_v43, %v158_v41  ;;  %v547_v43 = vmov 839922192  }
 0x123   :  { %v205_v46 = vpop.f32.mrf.mxu0  ;;  %v443_v44 = vunpack.c.l.s4 %v547_v43 }
 0x124   :  { %v206_v48 = vadd.f32 %v205_v46, %v182_v45 }
 0x125   :  { %v444_v45 = vunpack.c.0.s8 %v443_v44 }
 0x126   :  { %v228_v51 = vadd.f32 %v227_v49, %v206_v48 }
 0x128   :  { %v230_v53 = vsub.f32 0.0, %v228_v51 }
 0x12a   :  { %v231_v55 = vmul.f32 1.442695, %v230_v53 }
 0x12c   :  { %484 = vpow2.f32 %v231_v55 }
 0x132   :  { %v485_v56 = vpop.eup %484 }
 0x133   :  { %v233_v57 = vadd.f32 1.0, %v485_v56 }
 0x135   :  { %486 = vrcp.f32 %v233_v57  ;;  %v245_v61 = vand.u32 2147483648, %v233_v57  ;;  %v243_v63 = vand.u32 2147483647, %v233_v57  ;;  %vm239_vm5 = vweird.f32 %v233_v57 }
 0x137   :  { %v246_v3 = vor.u32 1.1754944e-38, %v245_v61  ;;  %vm244_vm7 = vcmp.eq.f32.partialorder %v243_v63, 8.507059e+37 }
 0x13b   :  { %v487_v58 = vpop.eup %486 }
 0x13c   :  { %v235_v59 = vmul.f32 %v487_v58, %v233_v57  ;;  %vm240_vm4 = vweird.f32 %v487_v58 }
 0x13d   :  { %vm241_vm6 = vmor %vm239_vm5, %vm240_vm4 }
 0x13e   :  { %v236_v60 = vsub.f32 1.0, %v235_v59 }
 0x140   :  { %v237_v62 = vmul.f32 %v487_v58, %v236_v60 }
 0x142   :  { %v238_v2 = vadd.f32 %v487_v58, %v237_v62 }
 0x144   :  { %v242_v4 = vsel %vm241_vm6, %v487_v58, %v238_v2 }
 0x145   :  { %v247_v5 = vsel %vm244_vm7, %v246_v3, %v242_v4 }
 0x146   :  { %v248_v6 = vmul.f32 %v247_v5, %v228_v51 }
 0x148   :  { %v256_v7 = vsel %vm254_vm8, %v248_v6, 0 }
 0x149   :  { %v279_v8 = vand.u32 4294901760, %v256_v7 }
 0x14b   :  { %310 = vmatmul.f32.vlgmr.msrb.gmra.mxu3 %v279_v8  ;;  %v280_v9 = vsub.f32 %v256_v7, %v279_v8 }
 0x14d   :  { %334 = vmatmul.f32.vlgmr.msra.gmra.mxu0 %v280_v9  ;;  %v281_v10 = vand.u32 4294901760, %v280_v9 }
 0x14f   :  { %358 = vmatmul.f32.vlgmr.msra.gmra.mxu1 %v281_v10  ;;  %v282_v11 = vsub.f32 %v280_v9, %v281_v10 }
 0x151   :  { %v283_v12 = vand.u32 4294901760, %v282_v11 }
 0x153   :  { %284 = vmatmul.f32.vlgmr.msrb.gmra.mxu2 %v283_v12  ;;  %404 = vmatmul.f32.vlgmr.msra.gmra.mxu3 %v279_v8 }
 0x15b   :  { %382 = vmatmul.f32.vlgmr.msra.gmra.mxu2 %v279_v8 }
 0x1ca   :  { %v335_v19 = vpop.f32.mrf.mxu0 }
 0x1cc   :  { %v359_v22 = vpop.f32.mrf.mxu1 }
 0x1ce   :  { %v311_v15 = vpop.f32.mrf.mxu3 }
 0x1d6   :  { %v285_v16 = vpop.f32.mrf.mxu2  ;;  %v405_v26 = vpop.f32.mrf.mxu3 }
 0x1d7   :  { %v286_v17 = vadd.f32 %v483_v14, %v285_v16 }
 0x1d9   :  { %v312_v18 = vadd.f32 %v311_v15, %v286_v17 }
 0x1db   :  { %v336_v21 = vadd.f32 %v335_v19, %v312_v18 }
 0x1dd   :  { %v360_v23 = vadd.f32 %v359_v22, %v336_v21 }
 0x1de   :  { %v383_v24 = vpop.f32.mrf.mxu2 }
 0x1df   :  { %v384_v25 = vadd.f32 %v383_v24, %v360_v23 }
 0x1e1   :  { %v406_v27 = vadd.f32 %v405_v26, %v384_v25 }
 0x1e3   :  { %v408_v28 = vsub.f32 0.0, %v406_v27 }
 0x1e5   :  { %v409_v20 = vmul.f32 1.442695, %v408_v28 }
 0x1e7   :  { %488 = vpow2.f32 %v409_v20 }
 0x1ed   :  { %v489_v29 = vpop.eup %488 }
 0x1ee   :  { %v411_v30 = vadd.f32 1.0, %v489_v29 }
 0x1f0   :  { %490 = vrcp.f32 %v411_v30  ;;  %v423_v34 = vand.u32 2147483648, %v411_v30  ;;  %v421_v36 = vand.u32 2147483647, %v411_v30  ;;  %vm417_vm10 = vweird.f32 %v411_v30 }
 0x1f2   :  { %v424_v38 = vor.u32 1.1754944e-38, %v423_v34  ;;  %vm422_vm12 = vcmp.eq.f32.partialorder %v421_v36, 8.507059e+37 }
 0x1f6   :  { %v491_v31 = vpop.eup %490 }
 0x1f7   :  { %v413_v32 = vmul.f32 %v491_v31, %v411_v30  ;;  %vm418_vm9 = vweird.f32 %v491_v31 }
 0x1f8   :  { %vm419_vm11 = vmor %vm417_vm10, %vm418_vm9 }
 0x1f9   :  { %v414_v33 = vsub.f32 1.0, %v413_v32 }
 0x1fb   :  { %v415_v35 = vmul.f32 %v491_v31, %v414_v33 }
 0x1fd   :  { %v416_v37 = vadd.f32 %v491_v31, %v415_v35 }
 0x1ff   :  { %v420_v39 = vsel %vm419_vm11, %v491_v31, %v416_v37 }
 0x200   :  { %v425_v40 = vsel %vm422_vm12, %v424_v38, %v420_v39 }
 0x201   :  { %v426_v41 = vperm.slane %v425_v40, 0  ;;  %v433_v42 = vperm.slane %v425_v40, 1 }
 0x203   :  { %431 = vperm.xlu1 %480, %v426_v41  }
 0x20b   :  { %438 = vperm.xlu1 %480, %v433_v42  }
 0x275   :  { %v432_v46 = vpop.permute.xlu1 %431 }
 0x276   :  { %v445_v47 = vperm.slane %v432_v46, %v444_v45 }
 0x278   :  { %v452_v48 = vmul.f32 %v445_v47, %v585_v0 }
 0x27a   :  { %454 = vst [vmem:[#allocation5] sm:$0xff] %v452_v48 }
 0x27d   :  { %v439_v49 = vpop.permute.xlu1 %438 }
 0x27e   :  { %v449_v50 = vperm.slane %v439_v49, %v444_v45 }
 0x280   :  { %v453_v51 = vmul.f32 %v449_v50, %v587_v1 }
 0x282   :  { %455 = vst [vmem:[#allocation5 + $0x8] sm:$0xff] %v453_v51 }
 0x283   :  { %468 = dma.vmem_to_hbm [thread:$0]  %s461_s29, 256, %s463_s7, [#allocation4], %s545_s23, %s545_s23, %s546_s24  }
 0x284   :  { %542 = dma.done.wait [#allocation4], 256  }
 0x285   :  { %543 = vsyncadd [#allocation4], 4294967040 }
 0x286   :  { %473 = vsyncpa [#allocation3], 1 }
 0x287   :  { %474 = vsyncpa [#allocation4], 1 }

</bundles_post_ra>
